<compile_context>
chip_gen: v7x
topology: tpu7x:2x2x1
jax: 0.10.0
libtpu: 0.0.40
codegen_flags: <defaults>
</compile_context>

<pallas_src>
import functools

import jax
import jax.numpy as jnp
from jax import lax
from jax.experimental import pallas as pl
from jax.experimental.pallas import tpu as pltpu


def _kd_loss_kernel(*refs, alpha, n_total, tile_n, sub, has_targets,
                    targets_resident, needs_mask):
    if has_targets:
        student_ref, teacher_ref, targets_ref, out_ref = refs
    else:
        student_ref, teacher_ref, out_ref = refs
        targets_ref = None

    i = pl.program_id(0)
    c = student_ref.shape[1]
    num_chunks = tile_n // sub

    def chunk(r0, acc):
        # r0: row offset of this sub-chunk inside the tile (multiple of `sub`).
        s = student_ref[pl.ds(r0, sub), :].astype(jnp.float32)   # (sub, C)
        t = teacher_ref[pl.ds(r0, sub), :].astype(jnp.float32)   # (sub, C)

        # Student: shifted logits + per-row log-sum-exp. log_softmax is never
        # materialized; per_row = s_lse - <w, s_shift> with sum_c(w) == 1.
        s_shift = s - jnp.max(s, axis=1, keepdims=True)
        s_lse = jnp.log(jnp.sum(jnp.exp(s_shift), axis=1, keepdims=True))

        # Teacher: unnormalized exp + per-row inverse partition function.
        # EUP approx reciprocal + 2 Newton steps (off the VPU divide path,
        # ~f32-accurate after refinement).
        t_exp = jnp.exp(t - jnp.max(t, axis=1, keepdims=True))
        zt = jnp.sum(t_exp, axis=1, keepdims=True)
        inv_zt = pl.reciprocal(zt, approx=True)
        inv_zt = inv_zt * (2.0 - zt * inv_zt)
        inv_zt = inv_zt * (2.0 - zt * inv_zt)

        if has_targets:
            # Fold alpha into the per-row scalar; apply the one-hot with a
            # single where-add (no (sub,C) onehot cast / extra FMA).
            w = (alpha * inv_zt) * t_exp
            if targets_resident:
                tgt_start = pl.multiple_of(i * tile_n + r0, sub)
            else:
                tgt_start = r0
            tgt = targets_ref[pl.ds(tgt_start, sub), :]          # (sub, 1) int32
            class_idx = lax.broadcasted_iota(jnp.int32, (sub, c), 1)
            w = jnp.where(class_idx == tgt, w + (1.0 - alpha), w)
        else:
            w = inv_zt * t_exp

        # Fused soft+hard per-row loss: single multiply + single lane reduce.
        per_row = s_lse - jnp.sum(w * s_shift, axis=1, keepdims=True)  # (sub,1)

        if needs_mask:
            # Padded rows may carry inf/nan through exp/log; the select
            # discards the unselected operand, so zeroing here is sufficient.
            row_idx = (i * tile_n + r0
                       + lax.broadcasted_iota(jnp.int32, (sub, 1), 0))
            per_row = jnp.where(row_idx < n_total, per_row, 0.0)

        return acc + per_row

    init = jnp.zeros((sub, 1), jnp.float32)
    if num_chunks == 1:
        acc = chunk(0, init)
    else:
        acc = lax.fori_loop(
            0, num_chunks,
            lambda ci, a: chunk(pl.multiple_of(ci * sub, sub), a),
            init, unroll=(num_chunks <= 8))

    # Per-tile partial sum, broadcast into this tile's private output block.
    partial = jnp.sum(acc)
    out_ref[...] = jnp.broadcast_to(partial, out_ref.shape).astype(jnp.float32)


def _round_up(x, m):
    return ((x + m - 1) // m) * m


def _vmem_capacity_bytes():
    try:
        info = pltpu.get_tpu_info()
        for attr in ("vmem_capacity_bytes", "vmem_bytes", "vmem_size_bytes"):
            v = getattr(info, attr, None)
            if v:
                return int(v)
    except Exception:
        pass
    return 64 * 1024 * 1024          # conservative fallback: v7x per-TC VMEM


def knowledge_distill_loss(student_logits, teacher_logits, targets=None,
                           alpha=0.7, tile_n=None):
    """Scalar float32 loss matching KnowledgeDistillLoss.forward."""
    n, c = student_logits.shape
    has_targets = targets is not None

    s_item = student_logits.dtype.itemsize
    t_item = teacher_logits.dtype.itemsize
    # bf16 packs natively as (16,128); keep sublane tiles aligned to that.
    align = 16 if min(s_item, t_item) < 4 else 8

    # ---- Generation-aware tile sizing (mem-bound streaming kernel) ---------
    # 2 logit inputs x 2 pipeline buffers target ~60% of per-core VMEM
    # (v5e/v6e 128 MiB -> ~77 MiB pipeline, v7x 64 MiB -> ~38 MiB), rows
    # capped at 4096 to bound per-step latency.
    cap = _vmem_capacity_bytes()
    budget = min(int(cap * 0.6), 80 * 1024 * 1024)
    bytes_per_row = c * (s_item + t_item)
    max_rows = max(align, budget // (2 * max(bytes_per_row, 1)))
    if tile_n is None:
        tile_n = min(_round_up(n, align), 4096, max_rows)
    tile_n = _round_up(max(1, int(tile_n)), align)
    tile_n = min(tile_n, _round_up(n, align))

    grid = pl.cdiv(n, tile_n)
    n_pad = grid * tile_n
    needs_mask = (n_pad != n)

    # Register-blocking sub-chunk: ~4 f32 arrays of (sub, C) must fit in the
    # 64 x 4 KiB vreg file; never smaller than the native packing.
    sub = align
    for cand in (32, 16):
        if cand > align and tile_n % cand == 0 and cand * c * 16 <= 192 * 1024:
            sub = cand
            break

    logit_spec = pl.BlockSpec((tile_n, c), lambda i: (i, 0))
    in_specs = [logit_spec, logit_spec]
    args = [student_logits, teacher_logits]

    targets_resident = False
    if has_targets:
        tgt = jnp.pad(targets.astype(jnp.int32).reshape(-1),
                      (0, n_pad - n)).reshape(n_pad, 1)
        # (n_pad, 1) int32 lane-pads to 512 B/row in VMEM; keep it resident
        # (one DMA, no per-step descriptor) while that stays small, otherwise
        # stream a (tile_n, 1) block per grid step.
        targets_resident = (n_pad * 128 * 4) <= (4 * 1024 * 1024)
        if targets_resident:
            in_specs.append(pl.BlockSpec((n_pad, 1), lambda i: (0, 0)))
        else:
            in_specs.append(pl.BlockSpec((tile_n, 1), lambda i: (i, 0)))
        args.append(tgt)

    # VMEM limit: actual pipelined footprint + headroom, clipped to capacity.
    pipe_bytes = 2 * tile_n * c * (s_item + t_item)
    if has_targets:
        tgt_bytes = n_pad * 128 * 4 if targets_resident else 2 * tile_n * 128 * 4
    else:
        tgt_bytes = 0
    out_bytes = 2 * 8 * 128 * 4
    vmem_limit = int(min(cap * 0.9,
                         pipe_bytes + tgt_bytes + out_bytes + (8 << 20)))
    vmem_limit = max(vmem_limit, 16 * 1024 * 1024)

    kernel = functools.partial(
        _kd_loss_kernel,
        alpha=float(alpha), n_total=int(n), tile_n=int(tile_n), sub=int(sub),
        has_targets=has_targets, targets_resident=targets_resident,
        needs_mask=needs_mask)

    partials = pl.pallas_call(
        kernel,
        out_shape=jax.ShapeDtypeStruct((grid, 8, 128), jnp.float32),
        grid_spec=pltpu.PrefetchScalarGridSpec(
            num_scalar_prefetch=0,
            grid=(grid,),
            in_specs=in_specs,
            out_specs=pl.BlockSpec((1, 8, 128), lambda i: (i, 0, 0)),
        ),
        compiler_params=pltpu.CompilerParams(
            dimension_semantics=("parallel",),   # independent per-tile partials
            vmem_limit_bytes=vmem_limit,
        ),
    )(*args)

    # Final reduction + mean in the wrapper (keeps the grid axis parallel so
    # v7x's two TensorCores both stream; also pairwise-sums the partials).
    return jnp.sum(partials[:, 0, 0]) / n


def _reference_loss(student, teacher, targets, alpha):
    s = student.astype(jnp.float32)
    t = teacher.astype(jnp.float32)
    log_p_s = jax.nn.log_softmax(s, axis=1)
    p_t = jax.nn.softmax(t, axis=1)
    soft = jnp.mean(jnp.sum(-p_t * log_p_s, axis=1))
    if targets is None:
        return soft
    hard = jnp.mean(-jnp.take_along_axis(log_p_s, targets[:, None], axis=1)[:, 0])
    return alpha * soft + (1.0 - alpha) * hard


if __name__ == "__main__":
    key = jax.random.PRNGKey(0)
    k1, k2, k3, k4, k5, k6 = jax.random.split(key, 6)
    alpha = 0.7

    # --- Case 1: small batch, single tile, with targets (soft + hard) ---
    N, C = 8, 16
    student_logits = jax.random.normal(k1, (N, C), dtype=jnp.float32)
    teacher_logits = jax.random.normal(k2, (N, C), dtype=jnp.float32)
    targets = jax.random.randint(k3, (N,), 0, C, dtype=jnp.int32)

    loss = knowledge_distill_loss(student_logits, teacher_logits, targets,
                                  alpha=alpha)
    jax.block_until_ready(loss)
    ref = _reference_loss(student_logits, teacher_logits, targets, alpha)
    assert jnp.allclose(loss, ref, rtol=1e-5, atol=1e-5), (loss, ref)

    # --- Case 2: no targets (soft loss only) ---
    loss_soft = knowledge_distill_loss(student_logits, teacher_logits, None,
                                       alpha=alpha)
    jax.block_until_ready(loss_soft)
    ref_soft = _reference_loss(student_logits, teacher_logits, None, alpha)
    assert jnp.allclose(loss_soft, ref_soft, rtol=1e-5, atol=1e-5), (loss_soft, ref_soft)

    # --- Case 3: multi-tile grid + remainder masking + bf16 ingestion ---
    N2, C2 = 24, 16
    s2 = jax.random.normal(k4, (N2, C2), dtype=jnp.bfloat16)
    t2 = jax.random.normal(k5, (N2, C2), dtype=jnp.bfloat16)
    tg2 = jax.random.randint(k6, (N2,), 0, C2, dtype=jnp.int32)

    loss2 = knowledge_distill_loss(s2, t2, tg2, alpha=alpha, tile_n=16)
    jax.block_until_ready(loss2)
    ref2 = _reference_loss(s2, t2, tg2, alpha)
    assert jnp.allclose(loss2, ref2, rtol=2e-2, atol=2e-2), (loss2, ref2)

    print("KERNEL_OK")
</pallas_src>

<mosaic_0001>
module attributes {stable_mosaic.version = 11 : i64} {
  func.func @_kd_loss_kernel(%arg0: i32, %arg1: memref<8x16xf32, #tpu.memory_space<vmem>>, %arg2: memref<8x16xf32, #tpu.memory_space<vmem>>, %arg3: memref<8x1xi32, #tpu.memory_space<vmem>>, %arg4: memref<1x8x128xf32, #tpu.memory_space<vmem>>) attributes {dimension_semantics = [#tpu.dimension_semantics<parallel>], iteration_bounds = array<i64: 1>, scalar_prefetch = 0 : i64, scratch_operands = 0 : i64, tpu.core_type = #tpu.core_type<tc>, window_params = [{transform_indices = @transform_0, window_bounds = array<i64: 8, 16>}, {transform_indices = @transform_1, window_bounds = array<i64: 8, 16>}, {pipeline_mode = #tpu.pipeline_mode<synchronous>, transform_indices = @transform_2, window_bounds = array<i64: 8, 1>}, {transform_indices = @transform_3, window_bounds = array<i64: 1, 8, 128>}]} {
    %cst = arith.constant 0.000000e+00 : f32
    %0 = vector.broadcast %cst : f32 to vector<8x1xf32>
    %c0 = arith.constant 0 : index
    %c0_0 = arith.constant 0 : index
    %1 = vector.load %arg1[%c0, %c0_0] : memref<8x16xf32, #tpu.memory_space<vmem>>, vector<8x16xf32>
    %c0_1 = arith.constant 0 : index
    %c0_2 = arith.constant 0 : index
    %2 = vector.load %arg2[%c0_1, %c0_2] : memref<8x16xf32, #tpu.memory_space<vmem>>, vector<8x16xf32>
    %cst_3 = arith.constant dense<0xFF800000> : vector<8xf32>
    %3 = vector.multi_reduction <maximumf>, %1, %cst_3 [1] : vector<8x16xf32> to vector<8xf32>
    %4 = vector.shape_cast %3 : vector<8xf32> to vector<8x1xf32>
    %5 = vector.broadcast %4 : vector<8x1xf32> to vector<8x16xf32>
    %6 = arith.subf %1, %5 : vector<8x16xf32>
    %7 = math.exp %6 : vector<8x16xf32>
    %cst_4 = arith.constant dense<0.000000e+00> : vector<8xf32>
    %8 = vector.multi_reduction <add>, %7, %cst_4 [1] : vector<8x16xf32> to vector<8xf32>
    %9 = vector.shape_cast %8 : vector<8xf32> to vector<8x1xf32>
    %10 = math.log %9 : vector<8x1xf32>
    %cst_5 = arith.constant dense<0xFF800000> : vector<8xf32>
    %11 = vector.multi_reduction <maximumf>, %2, %cst_5 [1] : vector<8x16xf32> to vector<8xf32>
    %12 = vector.shape_cast %11 : vector<8xf32> to vector<8x1xf32>
    %13 = vector.broadcast %12 : vector<8x1xf32> to vector<8x16xf32>
    %14 = arith.subf %2, %13 : vector<8x16xf32>
    %15 = math.exp %14 : vector<8x16xf32>
    %cst_6 = arith.constant dense<0.000000e+00> : vector<8xf32>
    %16 = vector.multi_reduction <add>, %15, %cst_6 [1] : vector<8x16xf32> to vector<8xf32>
    %17 = vector.shape_cast %16 : vector<8xf32> to vector<8x1xf32>
    %18 = tpu.reciprocal %17 {approx = true} : vector<8x1xf32> -> vector<8x1xf32>
    %19 = arith.mulf %17, %18 : vector<8x1xf32>
    %cst_7 = arith.constant 2.000000e+00 : f32
    %20 = vector.broadcast %cst_7 : f32 to vector<8x1xf32>
    %21 = arith.subf %20, %19 : vector<8x1xf32>
    %22 = arith.mulf %18, %21 : vector<8x1xf32>
    %23 = arith.mulf %17, %22 : vector<8x1xf32>
    %cst_8 = arith.constant 2.000000e+00 : f32
    %24 = vector.broadcast %cst_8 : f32 to vector<8x1xf32>
    %25 = arith.subf %24, %23 : vector<8x1xf32>
    %26 = arith.mulf %22, %25 : vector<8x1xf32>
    %cst_9 = arith.constant 0.699999988 : f32
    %27 = vector.broadcast %cst_9 : f32 to vector<8x1xf32>
    %28 = arith.mulf %27, %26 : vector<8x1xf32>
    %29 = vector.broadcast %28 : vector<8x1xf32> to vector<8x16xf32>
    %30 = arith.mulf %29, %15 : vector<8x16xf32>
    %c8_i32 = arith.constant 8 : i32
    %31 = arith.muli %arg0, %c8_i32 : i32
    %c0_i32 = arith.constant 0 : i32
    %32 = arith.addi %31, %c0_i32 : i32
    %33 = tpu.assume_multiple %32, 8 : i32
    %34 = arith.index_cast %33 : i32 to index
    %c0_10 = arith.constant 0 : index
    %35 = vector.load %arg3[%34, %c0_10] : memref<8x1xi32, #tpu.memory_space<vmem>>, vector<8x1xi32>
    %36 = tpu.iota {dimensions = array<i32: 1>} : vector<8x16xi32>
    %37 = vector.broadcast %35 : vector<8x1xi32> to vector<8x16xi32>
    %38 = arith.cmpi eq, %36, %37 : vector<8x16xi32>
    %cst_11 = arith.constant 3.000000e-01 : f32
    %39 = vector.broadcast %cst_11 : f32 to vector<8x16xf32>
    %40 = arith.addf %30, %39 : vector<8x16xf32>
    %41 = arith.select %38, %40, %30 : vector<8x16xi1>, vector<8x16xf32>
    %42 = arith.mulf %41, %6 : vector<8x16xf32>
    %cst_12 = arith.constant dense<0.000000e+00> : vector<8xf32>
    %43 = vector.multi_reduction <add>, %42, %cst_12 [1] : vector<8x16xf32> to vector<8xf32>
    %44 = vector.shape_cast %43 : vector<8xf32> to vector<8x1xf32>
    %45 = arith.subf %10, %44 : vector<8x1xf32>
    %46 = arith.addf %0, %45 : vector<8x1xf32>
    %47 = vector.shape_cast %46 : vector<8x1xf32> to vector<1x8x1xf32>
    %cst_13 = arith.constant dense<0.000000e+00> : vector<1xf32>
    %48 = vector.multi_reduction <add>, %47, %cst_13 [1, 2] : vector<1x8x1xf32> to vector<1xf32>
    %49 = vector.shape_cast %48 : vector<1xf32> to vector<1x1x1xf32>
    %50 = vector.extract %49[0, 0, 0] : f32 from vector<1x1x1xf32>
    %51 = vector.broadcast %50 : f32 to vector<1x8x128xf32>
    %c0_14 = arith.constant 0 : index
    %c0_15 = arith.constant 0 : index
    %c0_16 = arith.constant 0 : index
    %52 = vector.load %arg4[%c0_14, %c0_15, %c0_16] : memref<1x8x128xf32, #tpu.memory_space<vmem>>, vector<1x8x128xf32>
    tpu.vector_store %arg4[%c0_14, %c0_15, %c0_16], %51 {strides = array<i32>} : memref<1x8x128xf32, #tpu.memory_space<vmem>>, vector<1x8x128xf32>,
    return
  }
  func.func @transform_0(%arg0: i32) -> (i32, i32) {
    %c0_i32 = arith.constant 0 : i32
    %c0_i32_0 = arith.constant 0 : i32
    return %arg0, %c0_i32 : i32, i32
  }
  func.func @transform_1(%arg0: i32) -> (i32, i32) {
    %c0_i32 = arith.constant 0 : i32
    %c0_i32_0 = arith.constant 0 : i32
    return %arg0, %c0_i32 : i32, i32
  }
  func.func @transform_2(%arg0: i32) -> (i32, i32) {
    %c0_i32 = arith.constant 0 : i32
    %c0_i32_0 = arith.constant 0 : i32
    %c0_i32_1 = arith.constant 0 : i32
    return %c0_i32, %c0_i32_0 : i32, i32
  }
  func.func @transform_3(%arg0: i32) -> (i32, i32, i32) {
    %c0_i32 = arith.constant 0 : i32
    %c0_i32_0 = arith.constant 0 : i32
    %c0_i32_1 = arith.constant 0 : i32
    return %arg0, %c0_i32, %c0_i32_0 : i32, i32, i32
  }
}

</mosaic_0001>

<bundles_post_ra>
// kernel: tpu_custom_call.1
= control target key start
LH: loop header
LB: loop body
LE: loop exit
PB: predicated region body
PF: predicated region fallthrough
CT: control target
= control target key end

     0   :  { %8 = vsyncpa [#allocation3], 0  ;;  %s225_s0 = inlined_call_operand.vmem [shape: f32[8,16], index: 0, kind: input, shape index: {}]   ;;  %s226_s1 = inlined_call_operand.hbm [shape: f32[8,16], index: 1, kind: input, shape index: {}]   ;;  %s227_s2 = inlined_call_operand.vmem [shape: s32[8,1], index: 2, kind: input, shape index: {}]   ;;  %s228_s3 = inlined_call_operand.hbm [shape: f32[1,8,128], index: 3, kind: output, shape index: {}]  }
   0x1   :  { %9 = vsyncpa [#allocation4], 0  ;;  %s167_s12 = smov [#allocation2]   ;;  %s119_s16 = scalar_lea.hbm %s226_s1, 128 }
   0x2   :  { %s18_s13 = sshll.u32 %s167_s12, 4  ;;  %p120_p0 = scmp.ne.s32.totalorder %s226_s1, %s119_s16  ;;  %s19_s13 = int_to_ptr.vmem [resolvable:$true] %s18_s13 }
   0x3   :  { %p123_p1 = scmp.lt.u32.totalorder %s119_s16, %s226_s1 }
   0x5   :  { %p125_p2 = pnand %p123_p1, %p120_p0 }
   0x7   :  { %128 = shalt.err (!%p125_p2)
}
   0x8   :  { %s129_s21 = scalar_lea.vmem %s19_s13, 128  ;;  %p134_p4 = scmp.lt.s32.totalorder %s19_s13, %s19_s13 }
   0x9   :  { %p130_p3 = scmp.ne.s32.totalorder %s19_s13, %s129_s21  ;;  %p135_p5 = scmp.lt.s32.totalorder %s129_s21, %s129_s21 }
   0xb   :  { %p136_p6 = por %p135_p5, %p134_p4 }
   0xd   :  { %p137_p7 = pnand %p136_p6, %p130_p3 }
   0xf   :  { %140 = shalt.err (!%p137_p7)
}
  0x10   :  { %21 = dma.hbm_to_vmem [thread:$0]  %s226_s1, 128, %s19_s13, [#allocation3]  }
  0x11   :  { %163 = dma.done.wait [#allocation3], 128  }
  0x12   :  { %164 = vsyncadd [#allocation3], 4294967168  ;;  %vm29_vm0 = vcmask 130048   ;;  %v28_v0 = vld [vmem:[#allocation2] sm:$0xff]  ;;  %v168_v4 = vmov 0   ;;  %v62_v22 = vlaneseq  ;;  %vm76_vm2 = vcmask 7168  }
  0x13   :  { %v41_v1 = vsel %vm29_vm0, %v28_v0, -inf  ;;  %v27_v2 = vld [vmem:[%s225_s0] sm:$0xff]  ;;  %109 = vset.pattern.permute.xlu1 %v168_v4  ;;  %110 = vset.pattern.permute.xlu0 %v168_v4  ;;  %s169_s0 = smov [#allocation5]  }
  0x14   :  { %42 = vmax.xlane.f32.xlu0 %v41_v1  ;;  %v30_v3 = vsel %vm29_vm0, %v27_v2, -inf  ;;  %v61_v5 = vld [vmem:[%s227_s2] sm:$0xff]  ;;  %v63_v25 = vand.u32 127, %v62_v22  ;;  %s95_s1 = sshll.u32 %s169_s0, 4  ;;  %s96_s1 = int_to_ptr.vmem [resolvable:$true] %s95_s1 }
  0x15   :  { %31 = vmax.xlane.f32.xlu1 %v30_v3  ;;  %s141_s28 = scalar_lea.vmem %s96_s1, 128  ;;  %p146_p9 = scmp.lt.s32.totalorder %s96_s1, %s96_s1 }
  0x16   :  { %p142_p8 = scmp.ne.s32.totalorder %s96_s1, %s141_s28  ;;  %p147_p10 = scmp.lt.s32.totalorder %s141_s28, %s141_s28 }
  0x18   :  { %p148_p11 = por %p147_p10, %p146_p9 }
  0x1a   :  { %p149_p12 = pnand %p148_p11, %p142_p8 }
  0x26   :  { %65 = vperm.xlu1 %109, %v61_v5  }
  0xa1   :  { %v43_v6 = vpop.xlane.xlu0 %42 }
  0xa2   :  { %v44_v7 = vsub.f32 %v28_v0, %v43_v6  ;;  %v32_v11 = vpop.xlane.xlu1 %31 }
  0xa3   :  { %v33_v12 = vsub.f32 %v27_v2, %v32_v11 }
  0xa4   :  { %v45_v8 = vmul.f32 1.442695, %v44_v7 }
  0xa5   :  { %v34_v13 = vmul.f32 1.442695, %v33_v12 }
  0xa6   :  { %111 = vpow2.f32 %v45_v8  ;;  %v66_v27 = vpop.permute.xlu1 %65 }
  0xa7   :  { %113 = vpow2.f32 %v34_v13  ;;  %vm67_vm1 = vcmp.eq.s32.totalorder %v63_v25, %v66_v27 }
  0xb0   :  { %v112_v9 = vpop.eup %111 }
  0xb1   :  { %v47_v10 = vsel %vm29_vm0, %v112_v9, 0.0  ;;  %v114_v14 = vpop.eup %113 }
  0xb2   :  { %48 = vadd.xlane.f32.xlu0 %v47_v10  ;;  %v36_v15 = vsel %vm29_vm0, %v114_v14, 0.0 }
  0xb6   :  { %37 = vadd.xlane.f32.xlu0 %v36_v15 }
 0x13f   :  { %v49_v16 = vpop.xlane.xlu0 %48 }
 0x140   :  { %115 = vrcp.f32 %v49_v16 }
 0x143   :  { %v38_v33 = vpop.xlane.xlu0 %37 }
 0x144   :  { %117 = vlog2.f32 %v38_v33 }
 0x14a   :  { %v116_v17 = vpop.eup %115 }
 0x14b   :  { %v51_v18 = vmul.f32 %v116_v17, %v49_v16 }
 0x14d   :  { %v52_v19 = vsub.f32 2.0, %v51_v18 }
 0x14e   :  { %v118_v34 = vpop.eup %117 }
 0x14f   :  { %v53_v20 = vmul.f32 %v116_v17, %v52_v19  ;;  %v40_v35 = vmul.f32 0.6931472, %v118_v34 }
 0x151   :  { %v54_v21 = vmul.f32 %v53_v20, %v49_v16 }
 0x153   :  { %v55_v23 = vsub.f32 2.0, %v54_v21 }
 0x155   :  { %v56_v24 = vmul.f32 %v55_v23, %v53_v20 }
 0x157   :  { %v57_v26 = vmul.f32 0.7, %v56_v24 }
 0x159   :  { %v58_v28 = vmul.f32 %v112_v9, %v57_v26 }
 0x15b   :  { %v68_v29 = vadd.f32 0.3, %v58_v28 }
 0x15d   :  { %v69_v30 = vsel %vm67_vm1, %v68_v29, %v58_v28 }
 0x15e   :  { %v70_v31 = vmul.f32 %v69_v30, %v33_v12 }
 0x160   :  { %v71_v32 = vsel %vm29_vm0, %v70_v31, 0.0 }
 0x161   :  { %72 = vadd.xlane.f32.xlu0 %v71_v32 }
 0x1ee   :  { %v73_v36 = vpop.xlane.xlu0 %72 }
 0x1ef   :  { %v74_v37 = vsub.f32 %v40_v35, %v73_v36 }
 0x1f1   :  { %v77_v38 = vsel %vm76_vm2, %v74_v37, 0.0 }
 0x1f2   :  { %78 = vadd.xlane.f32.xlu0 %v77_v38 }
 0x27f   :  { %v79_v39 = vpop.xlane.xlu0 %78 }
 0x280   :  { %v80_v40 = vrot.slane %v79_v39, 4 }
 0x282   :  { %v81_v41 = vadd.f32 %v80_v40, %v79_v39 }
 0x284   :  { %v82_v42 = vrot.slane %v81_v41, 2 }
 0x286   :  { %v83_v43 = vadd.f32 %v82_v42, %v81_v41 }
 0x288   :  { %v84_v44 = vrot.slane %v83_v43, 1 }
 0x28a   :  { %v85_v45 = vadd.f32 %v84_v44, %v83_v43 }
 0x28c   :  { %104 = vpush %v85_v45 }
 0x2bd   :  { %s105_s2 = spop %104 }
 0x2be   :  { %v87_v46 = vstv %s105_s2 }
 0x2bf   :  { %88 = vst [vmem:[#allocation5] sm:$0xff] %v87_v46 }
 0x2c0   :  { %152 = shalt.err (!%p149_p12)
}
 0x2c1   :  { %s153_s4 = scalar_lea.hbm %s228_s3, 128 }
 0x2c2   :  { %p154_p13 = scmp.ne.s32.totalorder %s228_s3, %s153_s4  ;;  %p157_p0 = scmp.lt.u32.totalorder %s153_s4, %s228_s3 }
 0x2c4   :  { %p159_p1 = pnand %p157_p0, %p154_p13 }
 0x2c6   :  { %162 = shalt.err (!%p159_p1)
}
 0x2c7   :  { %98 = dma.vmem_to_hbm [thread:$0]  %s96_s1, 128, %s228_s3, [#allocation4]  }
 0x2c8   :  { %165 = dma.done.wait [#allocation4], 128  }
 0x2c9   :  { %166 = vsyncadd [#allocation4], 4294967168 }
 0x2ca   :  { %102 = vsyncpa [#allocation3], 1 }
 0x2cb   :  { %103 = vsyncpa [#allocation4], 1 }

</bundles_post_ra>
